<compile_context>
chip_gen: v5e
topology: v5e:2x2
jax: 0.10.0
libtpu: 0.0.40
codegen_flags: <defaults>
</compile_context>

<pallas_src>
import functools

import jax
import jax.numpy as jnp
import numpy as np
from jax.experimental import pallas as pl
from jax.experimental.pallas import tpu as pltpu

NEG_INF = -1e30        # additive mask value for non-edges (bf16-representable)
VALID_THRESH = -1e20   # running max above this => target node has >= 1 in-edge


# ------------------------------ kernels --------------------------------------

def gat_project_kernel(x_ref, w_ref, xh_ref, a_ref, *, hf):
    """x @ [W | W @ a_cat]: head projection + attention terms, one MXU pass."""
    x = x_ref[...].astype(jnp.bfloat16)                             # [TM, Din]
    y = jnp.dot(x, w_ref[...], preferred_element_type=jnp.float32)  # [TM,HF+2H]
    xh_ref[...] = y[:, :hf].astype(xh_ref.dtype)                    # bf16 store
    a_ref[...] = y[:, hf:]                                          # f32 [TM,2H]


def gat_attend_kernel(bias_ref, xh_ref, adst_ref, asrcT_ref, out_ref,
                      m_ref, l_ref, acc_ref, *,
                      num_heads, out_feats, negative_slope, apply_elu, concat):
    """Online-softmax masked attention + aggregation for one (row, src) tile."""
    H, F = num_heads, out_feats
    j = pl.program_id(1)

    @pl.when(j == 0)
    def _init():
        m_ref[...] = jnp.full(m_ref.shape, -jnp.inf, jnp.float32)
        l_ref[...] = jnp.zeros(l_ref.shape, jnp.float32)
        acc_ref[...] = jnp.zeros(acc_ref.shape, jnp.float32)

    bias = bias_ref[...].astype(jnp.float32)   # [TM, TN]  f32 softmax math
    xh = xh_ref[...]                           # [TN, HF]  bf16 source features
    a_dst = adst_ref[...]                      # [TM, H]   f32
    a_src = asrcT_ref[...]                     # [H, TN]   f32

    for h in range(H):                         # H is small & static: unrolled
        logits = a_dst[:, h:h + 1] + a_src[h:h + 1, :]            # [TM, TN]
        logits = jnp.maximum(logits, negative_slope * logits)     # leaky ReLU
        masked = logits + bias                                    # additive mask
        m_old = m_ref[:, h:h + 1]
        m_new = jnp.maximum(m_old, jnp.max(masked, axis=-1, keepdims=True))
        alpha = jnp.exp(m_old - m_new)                            # [TM, 1]
        p = jnp.exp(masked - m_new)                               # [TM, TN]
        l_ref[:, h:h + 1] = (alpha * l_ref[:, h:h + 1]
                             + jnp.sum(p, axis=-1, keepdims=True))
        m_ref[:, h:h + 1] = m_new
        agg = jnp.dot(p.astype(jnp.bfloat16), xh[:, h * F:(h + 1) * F],
                      preferred_element_type=jnp.float32)         # [TM, F]
        acc_ref[:, h * F:(h + 1) * F] = (
            alpha * acc_ref[:, h * F:(h + 1) * F] + agg)

    @pl.when(j == pl.num_programs(1) - 1)
    def _finalize():
        def inv_for(h):
            d = l_ref[:, h:h + 1]
            r = pl.reciprocal(d, approx=True)
            r = r * (2.0 - d * r)               # one Newton step -> ~exact f32
            return jnp.where(m_ref[:, h:h + 1] > VALID_THRESH, r, 0.0)

        def elu(v):
            return jnp.where(v > 0.0, v, jnp.exp(jnp.minimum(v, 0.0)) - 1.0)

        if concat:
            for h in range(H):
                sl = slice(h * F, (h + 1) * F)
                o = acc_ref[:, sl] * inv_for(h)
                if apply_elu:
                    o = elu(o)
                acc_ref[:, sl] = o
            # padding columns of acc stayed zero since init -> one dense store
            out_ref[...] = acc_ref[...].astype(out_ref.dtype)
        else:
            o = jnp.zeros((out_ref.shape[0], F), jnp.float32)
            for h in range(H):
                oh = acc_ref[:, h * F:(h + 1) * F] * inv_for(h)
                if apply_elu:            # spec applies activation before mean
                    oh = elu(oh)
                o = o + oh
            o = o * (1.0 / H)
            pad = out_ref.shape[1] - F
            if pad > 0:
                o = jnp.concatenate(
                    [o, jnp.zeros((out_ref.shape[0], pad), jnp.float32)],
                    axis=-1)
            out_ref[...] = o.astype(out_ref.dtype)


# ------------------------------ wrapper ---------------------------------------

def _round_up(x, m):
    return ((x + m - 1) // m) * m


def _pick_block_m(n, requested):
    # keep >= 2 row tiles when possible (megacore), respect the sublane rule
    for bm in (requested, 512, 256, 128, 64, 32, 16, 8):
        if 0 < bm <= n and n % bm == 0 and bm % 8 == 0:
            return bm
    return n


def _pick_block_n(n, requested):
    # source-axis tile: multiple of 128 lanes that divides N, else whole axis
    for bn in (requested, 1024, 512, 256, 128):
        if 0 < bn <= n and n % bn == 0 and bn % 128 == 0:
            return bn
    return n


def _vmem_cap_bytes():
    try:
        info = pltpu.get_tpu_info()
        phys = int(getattr(info, "vmem_capacity_bytes", 64 * 1024 * 1024))
    except Exception:                              # conservative (v7x) default
        phys = 64 * 1024 * 1024
    return (phys * 3) // 4


def _compiler_params(block_bytes, dims):
    kwargs = dict(dimension_semantics=dims)
    # Raise the scoped-VMEM limit only when the working set outgrows the 32 MiB
    # default; cap at 3/4 of physical VMEM (64 MiB on v7x, 128 MiB on v5e/v6e).
    if block_bytes > 28 * 1024 * 1024:
        kwargs["vmem_limit_bytes"] = int(min(block_bytes * 2, _vmem_cap_bytes()))
    return pltpu.CompilerParams(**kwargs)


def gat_conv(x, adj_bias, params, *, apply_elu, concat, negative_slope=0.2,
             block_m=128, block_n=256, out_dtype=jnp.float32):
    """One GATConv layer.  x: [N, Din] bf16, adj_bias: [N, N] bf16 (0 / -1e30)."""
    N, din = x.shape
    H = params["heads"]
    F = params["out_feats"]
    HF = H * F

    bm = _pick_block_m(N, block_m)
    bn = _pick_block_n(N, block_n)
    num_m = N // bm
    num_n = N // bn

    # ---- stage 1: fused projection + attention terms (row-tiled) ------------
    proj_bytes = (2 * (bm * din * 2 + bm * HF * 2 + bm * 2 * H * 4)
                  + din * (HF + 2 * H) * 2)
    xh, a_all = pl.pallas_call(
        functools.partial(gat_project_kernel, hf=int(HF)),
        out_shape=(jax.ShapeDtypeStruct((N, HF), jnp.bfloat16),
                   jax.ShapeDtypeStruct((N, 2 * H), jnp.float32)),
        grid=(num_m,),
        in_specs=[
            pl.BlockSpec((bm, din), lambda i: (i, 0)),           # x row tile
            pl.BlockSpec((din, HF + 2 * H), lambda i: (0, 0)),   # [W | W@a_cat]
        ],
        out_specs=(
            pl.BlockSpec((bm, HF), lambda i: (i, 0)),
            pl.BlockSpec((bm, 2 * H), lambda i: (i, 0)),
        ),
        compiler_params=_compiler_params(proj_bytes, ("parallel",)),
    )(x, params["w_cat"])

    a_dst = a_all[:, :H]          # [N, H] per-target attention term
    a_srcT = a_all[:, H:].T       # [H, N] per-source attention term (row layout)

    # ---- stage 2: flash-style masked softmax + aggregation ------------------
    out_cols = HF if concat else F
    out_pad = _round_up(out_cols, 128)            # lane-dense padded output
    acc_cols = _round_up(HF, 128)

    kernel = functools.partial(
        gat_attend_kernel,
        num_heads=int(H), out_feats=int(F),
        negative_slope=float(negative_slope),
        apply_elu=bool(apply_elu), concat=bool(concat))

    attn_bytes = (2 * (bm * bn * 2 + bn * HF * 2)      # streamed tiles, 2x buf
                  + 2 * (bm * H * 4 + H * bn * 4)
                  + bm * out_pad * 4
                  + bm * (2 * H + acc_cols) * 4
                  + 6 * bm * bn * 4)                   # in-kernel temporaries

    out = pl.pallas_call(
        kernel,
        out_shape=jax.ShapeDtypeStruct((N, out_pad), out_dtype),
        grid=(num_m, num_n),
        in_specs=[
            pl.BlockSpec((bm, bn), lambda i, j: (i, j)),   # adjacency bias tile
            pl.BlockSpec((bn, HF), lambda i, j: (j, 0)),   # xh for source block
            pl.BlockSpec((bm, H), lambda i, j: (i, 0)),    # a_dst (target rows)
            pl.BlockSpec((H, bn), lambda i, j: (0, j)),    # a_src (source block)
        ],
        out_specs=pl.BlockSpec((bm, out_pad), lambda i, j: (i, 0)),
        scratch_shapes=[
            pltpu.VMEM((bm, H), jnp.float32),         # running max per head
            pltpu.VMEM((bm, H), jnp.float32),         # running denom per head
            pltpu.VMEM((bm, acc_cols), jnp.float32),  # output accumulator
        ],
        compiler_params=_compiler_params(attn_bytes, ("parallel", "arbitrary")),
    )(adj_bias, xh, a_dst, a_srcT)
    return out[:, :out_cols]


def gat_forward(x, adj, layers, *, block_m=128, block_n=256):
    # Dense adjacency (adj[i, j] != 0 iff edge j -> i) -> additive bf16 bias.
    adj_bias = jnp.where(adj != 0, 0.0, NEG_INF).astype(jnp.bfloat16)
    h = x.astype(jnp.bfloat16)       # carry activations in bf16 between layers
    n_layers = len(layers)
    for li, layer in enumerate(layers):
        last = li == n_layers - 1
        h = gat_conv(h, adj_bias, layer["params"],
                     apply_elu=layer["apply_elu"], concat=layer["concat"],
                     block_m=block_m, block_n=block_n,
                     out_dtype=jnp.float32 if last else jnp.bfloat16)
    return h


# --------------------------- parameter creation --------------------------------

def glorot_uniform(key, shape, fan_in, fan_out):
    bound = float(np.sqrt(6.0 / (fan_in + fan_out)))
    return jax.random.uniform(key, shape, jnp.float32, -bound, bound)


def make_gat_params(key, num_layers, in_feats, num_hidden, num_classes, heads):
    layers = []
    dims = [(in_feats, num_hidden, heads[0], True, True)]
    for l in range(num_layers - 2):
        dims.append((num_hidden * heads[l], num_hidden, heads[l + 1], True, True))
    dims.append((num_hidden * heads[-2], num_classes, heads[-1], False, False))

    for (din, f, h, apply_elu, concat) in dims:
        key, kw, ki, kj = jax.random.split(key, 4)
        # nn.Linear(din, h*f, bias=False), glorot; stored as [Din, H*F].
        w = np.asarray(glorot_uniform(kw, (din, h * f), din, h * f))
        # att_i / att_j: torch shape (1, H, F); PyG glorot bound sqrt(6/(H+F)).
        att_i = np.asarray(glorot_uniform(ki, (h, f), h, f))
        att_j = np.asarray(glorot_uniform(kj, (h, f), h, f))
        # a_cat block matrix: xh @ a_cat gives (x_i.att_i) in cols [0,H) and
        # (x_j.att_j) in [H,2H).  Pre-fold into W so stage 1 is ONE matmul.
        a_cat = np.zeros((h * f, 2 * h), np.float32)
        for hh in range(h):
            a_cat[hh * f:(hh + 1) * f, hh] = att_i[hh]
            a_cat[hh * f:(hh + 1) * f, h + hh] = att_j[hh]
        w_cat = np.concatenate([w, w @ a_cat], axis=1)        # [Din, HF + 2H]
        params = {
            "w_cat": jnp.asarray(w_cat, jnp.bfloat16),   # bf16 MXU weights
            "heads": h,
            "out_feats": f,
        }
        layers.append({"params": params, "apply_elu": apply_elu,
                       "concat": concat})
    return layers


# --------------------------- pure-JAX reference --------------------------------

def gat_conv_ref(x, adj_bias, params, *, apply_elu, concat, negative_slope=0.2):
    H, F = params["heads"], params["out_feats"]
    HF = H * F
    y = jnp.dot(x.astype(jnp.bfloat16), params["w_cat"],
                preferred_element_type=jnp.float32)
    xh = y[:, :HF].astype(jnp.bfloat16)
    a_dst, a_src = y[:, HF:HF + H], y[:, HF + H:]
    outs = []
    for h in range(H):
        logits = a_dst[:, h:h + 1] + a_src[:, h][None, :]
        logits = jnp.maximum(logits, negative_slope * logits)
        masked = logits + adj_bias
        m = jnp.max(masked, axis=-1, keepdims=True)
        e = jnp.exp(masked - m)
        d = jnp.sum(e, axis=-1, keepdims=True)
        inv = jnp.where(m > VALID_THRESH, 1.0 / d, 0.0)
        # mirror the kernel: aggregate unnormalized bf16 weights, scale after
        agg = jnp.dot(e.astype(jnp.bfloat16), xh[:, h * F:(h + 1) * F],
                      preferred_element_type=jnp.float32)
        o = agg * inv
        if apply_elu:
            o = jnp.where(o > 0.0, o, jnp.exp(jnp.minimum(o, 0.0)) - 1.0)
        outs.append(o)
    return (jnp.concatenate(outs, axis=-1) if concat
            else sum(outs) * (1.0 / H))


def gat_forward_ref(x, adj, layers):
    adj_bias = jnp.where(adj != 0, 0.0, NEG_INF).astype(jnp.bfloat16)
    adj_bias = adj_bias.astype(jnp.float32)
    h = x.astype(jnp.bfloat16)
    n_layers = len(layers)
    for li, layer in enumerate(layers):
        o = gat_conv_ref(h, adj_bias, layer["params"],
                         apply_elu=layer["apply_elu"], concat=layer["concat"])
        h = o if li == n_layers - 1 else o.astype(jnp.bfloat16)
    return h


# ----------------------------------- main --------------------------------------

if __name__ == "__main__":
    N = 256            # nodes (multiple of 128 -> lane-dense tiles)
    IN_FEATS = 64
    NUM_HIDDEN = 16
    NUM_CLASSES = 8
    NUM_LAYERS = 2
    HEADS = [4, 4]
    BLOCK_M = 128      # 2 row tiles    -> exercises the "parallel" axis
    BLOCK_N = 128      # 2 source tiles -> exercises the online-softmax axis

    key = jax.random.PRNGKey(0)
    kx, kadj, kp = jax.random.split(key, 3)

    x = jax.random.normal(kx, (N, IN_FEATS), jnp.float32)
    # dense adjacency mask: adj[i, j] = 1 iff edge j -> i
    adj = jax.random.bernoulli(kadj, 0.15, (N, N)).astype(jnp.float32)

    layers = make_gat_params(kp, NUM_LAYERS, IN_FEATS, NUM_HIDDEN,
                             NUM_CLASSES, HEADS)

    out = jax.block_until_ready(
        gat_forward(x, adj, layers, block_m=BLOCK_M, block_n=BLOCK_N))
    assert out.shape == (N, NUM_CLASSES), out.shape

    ref = jax.block_until_ready(gat_forward_ref(x, adj, layers))
    np.testing.assert_allclose(np.asarray(out), np.asarray(ref),
                               rtol=1e-2, atol=1e-2)

    print("KERNEL_OK")
</pallas_src>

<mosaic_0001>
module attributes {stable_mosaic.version = 11 : i64} {
  func.func @gat_project_kernel(%arg0: i32, %arg1: memref<128x64xbf16, #tpu.memory_space<vmem>>, %arg2: memref<64x72xbf16, #tpu.memory_space<vmem>>, %arg3: memref<128x64xbf16, #tpu.memory_space<vmem>>, %arg4: memref<128x8xf32, #tpu.memory_space<vmem>>) attributes {dimension_semantics = [#tpu.dimension_semantics<parallel>], iteration_bounds = array<i64: 2>, scalar_prefetch = 0 : i64, scratch_operands = 0 : i64, tpu.core_type = #tpu.core_type<tc>, window_params = [{transform_indices = @transform_0, window_bounds = array<i64: 128, 64>}, {pipeline_mode = #tpu.pipeline_mode<synchronous>, transform_indices = @transform_1, window_bounds = array<i64: 64, 72>}, {transform_indices = @transform_2, window_bounds = array<i64: 128, 64>}, {transform_indices = @transform_3, window_bounds = array<i64: 128, 8>}]} {
    %c0 = arith.constant 0 : index
    %c0_0 = arith.constant 0 : index
    %0 = vector.load %arg1[%c0, %c0_0] : memref<128x64xbf16, #tpu.memory_space<vmem>>, vector<128x64xbf16>
    %c0_1 = arith.constant 0 : index
    %c0_2 = arith.constant 0 : index
    %1 = vector.load %arg2[%c0_1, %c0_2] : memref<64x72xbf16, #tpu.memory_space<vmem>>, vector<64x72xbf16>
    %cst = arith.constant dense<0.000000e+00> : vector<128x72xf32>
    %2 = tpu.matmul %0, %1, %cst {dimension_numbers = #tpu.dot_dimension_numbers<[1], [0], [0], [1], [0, 0, 1, 1], [], []>} : vector<128x64xbf16>, vector<64x72xbf16>, vector<128x72xf32> -> vector<128x72xf32>
    %3 = vector.extract_strided_slice %2 {offsets = [0, 0], sizes = [128, 64], strides = [1, 1]} : vector<128x72xf32> to vector<128x64xf32>
    %4 = arith.truncf %3 : vector<128x64xf32> to vector<128x64xbf16>
    %c0_3 = arith.constant 0 : index
    %c0_4 = arith.constant 0 : index
    %5 = vector.load %arg3[%c0_3, %c0_4] : memref<128x64xbf16, #tpu.memory_space<vmem>>, vector<128x64xbf16>
    tpu.vector_store %arg3[%c0_3, %c0_4], %4 {strides = array<i32>} : memref<128x64xbf16, #tpu.memory_space<vmem>>, vector<128x64xbf16>,
    %6 = vector.extract_strided_slice %2 {offsets = [0, 64], sizes = [128, 8], strides = [1, 1]} : vector<128x72xf32> to vector<128x8xf32>
    %c0_5 = arith.constant 0 : index
    %c0_6 = arith.constant 0 : index
    %7 = vector.load %arg4[%c0_5, %c0_6] : memref<128x8xf32, #tpu.memory_space<vmem>>, vector<128x8xf32>
    tpu.vector_store %arg4[%c0_5, %c0_6], %6 {strides = array<i32>} : memref<128x8xf32, #tpu.memory_space<vmem>>, vector<128x8xf32>,
    return
  }
  func.func @transform_0(%arg0: i32) -> (i32, i32) {
    %c0_i32 = arith.constant 0 : i32
    %c0_i32_0 = arith.constant 0 : i32
    return %arg0, %c0_i32 : i32, i32
  }
  func.func @transform_1(%arg0: i32) -> (i32, i32) {
    %c0_i32 = arith.constant 0 : i32
    %c0_i32_0 = arith.constant 0 : i32
    %c0_i32_1 = arith.constant 0 : i32
    return %c0_i32, %c0_i32_0 : i32, i32
  }
  func.func @transform_2(%arg0: i32) -> (i32, i32) {
    %c0_i32 = arith.constant 0 : i32
    %c0_i32_0 = arith.constant 0 : i32
    return %arg0, %c0_i32 : i32, i32
  }
  func.func @transform_3(%arg0: i32) -> (i32, i32) {
    %c0_i32 = arith.constant 0 : i32
    %c0_i32_0 = arith.constant 0 : i32
    return %arg0, %c0_i32 : i32, i32
  }
}

</mosaic_0001>

<bundles_post_ra>
// kernel: tpu_custom_call.1
= control target key start
LH: loop header
LB: loop body
LE: loop exit
PB: predicated region body
PF: predicated region fallthrough
CT: control target
= control target key end

     0   :  { %s686_s12 = smov 0   ;;  %s814_s0 = inlined_call_operand.vmem [shape: bf16[256,64], index: 0, kind: input, shape index: {}]   ;;  %s815_s1 = inlined_call_operand.vmem [shape: bf16[64,72], index: 1, kind: input, shape index: {}]   ;;  %s816_s2 = inlined_call_operand.vmem [shape: bf16[256,64], index: 2, kind: output, shape index: {0}]   ;;  %s817_s3 = inlined_call_operand.vmem [shape: f32[256,8], index: 3, kind: output, shape index: {1}]  }
   0x1 LB: > { %s555_s13 = sadd.s32 4294967295, %s663_s12   ;;  %p559_p0 = scmp.ge.s32.totalorder %s663_s12, 1  ;;  %s663_s12 = sphi %s686_s12, %s14_s12  }
   0x2   : > { %p141_p1 = scmp.lt.s32.totalorder %s663_s12, 3 }
   0x4   : > { %p142_p2 = pnand %p559_p0, %p141_p1 }
   0x5   : > { %s560_s16 = sshll.u32 (!%p142_p2), %s555_s13, 4  ;;  %s665_s30 = smov (!%p142_p2), 64  }
   0x6   : > { %145 = sbr.rel (%p142_p2) target bundleno = 318 (0x13e), region = 28  ;;  %p171_p3 = scmp.lt.s32.totalorder (!%p142_p2), %s560_s16, 31 }
   0xb   : > { %v635_v0 = vld [vmem:[%s815_s1 + $0x18] sm:$0xff]  ;;  %v634_v1 = vld [vmem:[%s815_s1 + $0x10] sm:$0xff]  ;;  %s819_s16 = smov (!%p171_p3, %s560_s16), 31  ;;  %v633_v2 = vld [vmem:[%s815_s1 + $0x8] sm:$0xff]  ;;  %vm277_vm0 = vcmask 523264   ;;  %vm367_vm1 = vcmask 519168  }
   0xc   : > { %306 = vmatpush.bf16.msra.mxu0 %v635_v0  ;;  %636 = vmatpush.bf16.msra.mxu1 %v635_v0  ;;  %s561_s21 = sshll.u32 %s819_s16, 2  ;;  %v632_v3 = vld [vmem:[%s815_s1] sm:$0xff]  ;;  %s565_s4 = sshll.u32 %s819_s16, 3  ;;  %vm448_vm2 = vcmask 64512  }
   0xd   : > { %637 = vmatpush.bf16.msra.mxu2 %v635_v0  ;;  %638 = vmatpush.bf16.msra.mxu3 %v635_v0  ;;  %s174_s26 = scalar_lea.vmem %s814_s0, %s561_s21  ;;  %s723_s29 = scalar_lea.vmem %s816_s2, %s561_s21 }
   0xe   : > { %v624_v4 = vld [vmem:[%s174_s26] sm:$0xff]  ;;  %v626_v5 = vld [vmem:[%s174_s26 + $0x10] sm:$0xff]  ;;  %v625_v8 = vld [vmem:[%s174_s26 + $0x8] sm:$0xff]  ;;  %s777_s7 = scalar_lea.vmem %s817_s3, %s565_s4 }
   0xf   : > { %v628_v6 = vld [vmem:[%s174_s26 + $0x20] sm:$0xff]  ;;  %v630_v7 = vld [vmem:[%s174_s26 + $0x30] sm:$0xff]  ;;  %v627_v9 = vld [vmem:[%s174_s26 + $0x18] sm:$0xff] }
  0x10   : > { %307 = vmatpush.bf16.msra.mxu0 %v634_v1  ;;  %639 = vmatpush.bf16.msra.mxu1 %v634_v1  ;;  %v629_v10 = vld [vmem:[%s174_s26 + $0x28] sm:$0xff]  ;;  %v631_v11 = vld [vmem:[%s174_s26 + $0x38] sm:$0xff] }
  0x11   : > { %640 = vmatpush.bf16.msra.mxu2 %v634_v1  ;;  %641 = vmatpush.bf16.msra.mxu3 %v634_v1 }
  0x14   : > { %308 = vmatpush.bf16.msra.mxu0 %v633_v2  ;;  %642 = vmatpush.bf16.msra.mxu1 %v633_v2 }
  0x15   : > { %643 = vmatpush.bf16.msra.mxu2 %v633_v2  ;;  %644 = vmatpush.bf16.msra.mxu3 %v633_v2 }
  0x18   : > { %309 = vmatpush.bf16.msra.mxu0 %v632_v3  ;;  %645 = vmatpush.bf16.msra.mxu1 %v632_v3 }
  0x19   : > { %646 = vmatpush.bf16.msra.mxu2 %v632_v3  ;;  %647 = vmatpush.bf16.msra.mxu3 %v632_v3 }
  0x1b   : > { %614 = vmatmul.msk.bf16.vlgmr.msra.gmra.mxu0 %vm277_vm0, %v624_v4  ;;  %616 = vmatmul.msk.bf16.vlgmr.msra.gmra.mxu1 %vm277_vm0, %v626_v5 }
  0x1c   : > { %618 = vmatmul.msk.bf16.vlgmr.msra.gmra.mxu2 %vm277_vm0, %v628_v6  ;;  %620 = vmatmul.msk.bf16.vlgmr.msra.gmra.mxu3 %vm277_vm0, %v630_v7 }
  0x2b   : > { %615 = vmatmul.msk.bf16.gmra.mxu0 %vm277_vm0, %v625_v8  ;;  %617 = vmatmul.msk.bf16.gmra.mxu1 %vm277_vm0, %v627_v9 }
  0x2c   : > { %619 = vmatmul.msk.bf16.gmra.mxu2 %vm277_vm0, %v629_v10  ;;  %621 = vmatmul.msk.bf16.gmra.mxu3 %vm277_vm0, %v631_v11 }
  0x98   : > { %v311_v12 = vpop.f32.mrf.mxu0  ;;  %v321_v13 = vpop.f32.mrf.mxu1 }
  0x99   : > { %v351_v14 = vpack.c.bf16 %v311_v12, %v311_v12  ;;  %v355_v15 = vpack.c.bf16 %v321_v13, %v321_v13  ;;  %408 = vrot.lane.b32.xlu2 %v321_v13, %s665_s30  ;;  %400 = vrot.lane.b32.xlu0 %v311_v12, %s665_s30 }
  0x9b   : > { %368 = vst.msk [vmem:[%s723_s29] sm:$0xf] %vm367_vm1, %v351_v14 }
  0x9c   : > { %372 = vst.msk [vmem:[%s723_s29 + $0x10] sm:$0xf] %vm367_vm1, %v355_v15 }
  0x9f   : > { %v331_v16 = vpop.f32.mrf.mxu2  ;;  %v341_v17 = vpop.f32.mrf.mxu3 }
  0xa0   : > { %v359_v18 = vpack.c.bf16 %v331_v16, %v331_v16  ;;  %v313_v19 = vpop.f32.mrf.mxu0  ;;  %v363_v20 = vpack.c.bf16 %v341_v17, %v341_v17  ;;  %v323_v21 = vpop.f32.mrf.mxu1 }
  0xa1   : > { %v352_v22 = vpack.c.bf16 %v313_v19, %v313_v19  ;;  %416 = vrot.lane.b32.xlu2 %v331_v16, %s665_s30  ;;  %424 = vrot.lane.b32.xlu0 %v341_v17, %s665_s30  ;;  %v356_v23 = vpack.c.bf16 %v323_v21, %v323_v21 }
  0xa2   : > { %376 = vst.msk [vmem:[%s723_s29 + $0x20] sm:$0xf] %vm367_vm1, %v359_v18 }
  0xa3   : > { %369 = vst.msk [vmem:[%s723_s29 + $0x4] sm:$0xf] %vm367_vm1, %v352_v22 }
  0xa4   : > { %380 = vst.msk [vmem:[%s723_s29 + $0x30] sm:$0xf] %vm367_vm1, %v363_v20 }
  0xa5   : > { %373 = vst.msk [vmem:[%s723_s29 + $0x14] sm:$0xf] %vm367_vm1, %v356_v23 }
  0xa7   : > { %v333_v24 = vpop.f32.mrf.mxu2  ;;  %v343_v25 = vpop.f32.mrf.mxu3 }
  0xa8   : > { %v360_v26 = vpack.c.bf16 %v333_v24, %v333_v24  ;;  %v316_v27 = vpop.f32.mrf.mxu0  ;;  %v364_v28 = vpack.c.bf16 %v343_v25, %v343_v25  ;;  %v326_v29 = vpop.f32.mrf.mxu1 }
  0xa9   : > { %v353_v30 = vpack.c.bf16 %v316_v27, %v316_v27  ;;  %410 = vrot.lane.b32.xlu2 %v323_v21, %s665_s30  ;;  %402 = vrot.lane.b32.xlu0 %v313_v19, %s665_s30  ;;  %v357_v31 = vpack.c.bf16 %v326_v29, %v326_v29 }
  0xaa   : > { %377 = vst.msk [vmem:[%s723_s29 + $0x24] sm:$0xf] %vm367_vm1, %v360_v26  ;;  %404 = vrot.lane.b32.xlu1 %v316_v27, %s665_s30 }
  0xab   : > { %370 = vst.msk [vmem:[%s723_s29 + $0x8] sm:$0xf] %vm367_vm1, %v353_v30 }
  0xac   : > { %381 = vst.msk [vmem:[%s723_s29 + $0x34] sm:$0xf] %vm367_vm1, %v364_v28 }
  0xad   : > { %374 = vst.msk [vmem:[%s723_s29 + $0x18] sm:$0xf] %vm367_vm1, %v357_v31 }
  0xaf   : > { %v336_v32 = vpop.f32.mrf.mxu2  ;;  %v346_v33 = vpop.f32.mrf.mxu3 }
  0xb0   : > { %v361_v34 = vpack.c.bf16 %v336_v32, %v336_v32  ;;  %v318_v35 = vpop.f32.mrf.mxu0  ;;  %v328_v36 = vpop.f32.mrf.mxu1  ;;  %v365_v39 = vpack.c.bf16 %v346_v33, %v346_v33 }
  0xb1   : > { %v354_v37 = vpack.c.bf16 %v318_v35, %v318_v35  ;;  %418 = vrot.lane.b32.xlu0 %v333_v24, %s665_s30  ;;  %v358_v38 = vpack.c.bf16 %v328_v36, %v328_v36 }
  0xb2   : > { %378 = vst.msk [vmem:[%s723_s29 + $0x28] sm:$0xf] %vm367_vm1, %v361_v34  ;;  %420 = vrot.lane.b32.xlu1 %v336_v32, %s665_s30 }
  0xb3   : > { %371 = vst.msk [vmem:[%s723_s29 + $0xc] sm:$0xf] %vm367_vm1, %v354_v37 }
  0xb4   : > { %375 = vst.msk [vmem:[%s723_s29 + $0x1c] sm:$0xf] %vm367_vm1, %v358_v38 }
  0xb5   : > { %382 = vst.msk [vmem:[%s723_s29 + $0x38] sm:$0xf] %vm367_vm1, %v365_v39 }
  0xb7   : > { %v338_v40 = vpop.f32.mrf.mxu2  ;;  %v348_v41 = vpop.f32.mrf.mxu3 }
  0xb8   : > { %v362_v42 = vpack.c.bf16 %v338_v40, %v338_v40  ;;  %422 = vrot.lane.b32.xlu2 %v338_v40, %s665_s30  ;;  %v366_v43 = vpack.c.bf16 %v348_v41, %v348_v41 }
  0xb9   : > { %412 = vrot.lane.b32.xlu0 %v326_v29, %s665_s30 }
  0xba   : > { %379 = vst.msk [vmem:[%s723_s29 + $0x2c] sm:$0xf] %vm367_vm1, %v362_v42  ;;  %406 = vrot.lane.b32.xlu1 %v318_v35, %s665_s30 }
  0xbb   : > { %383 = vst.msk [vmem:[%s723_s29 + $0x3c] sm:$0xf] %vm367_vm1, %v366_v43 }
  0xc0   : > { %428 = vrot.lane.b32.xlu2 %v346_v33, %s665_s30 }
  0xc1   : > { %430 = vrot.lane.b32.xlu0 %v348_v41, %s665_s30 }
  0xc2   : > { %414 = vrot.lane.b32.xlu1 %v328_v36, %s665_s30 }
  0xca   : > { %426 = vrot.lane.b32.xlu1 %v343_v25, %s665_s30 }
  0xf3   : > { %v409_v44 = vpop.permute.xlu2 %408 }
  0xf4   : > { %453 = vst.msk [vmem:[%s777_s7 + $0x20] sm:$0xff] %vm448_vm2, %v409_v44 }
  0xfb   : > { %v417_v45 = vpop.permute.xlu2 %416 }
  0xfc   : > { %457 = vst.msk [vmem:[%s777_s7 + $0x40] sm:$0xff] %vm448_vm2, %v417_v45 }
 0x103   : > { %v411_v46 = vpop.permute.xlu2 %410 }
 0x104   : > { %454 = vst.msk [vmem:[%s777_s7 + $0x28] sm:$0xff] %vm448_vm2, %v411_v46 }
 0x10b   : > { %v401_v47 = vpop.permute.xlu0 %400 }
 0x10c   : > { %449 = vst.msk [vmem:[%s777_s7] sm:$0xff] %vm448_vm2, %v401_v47 }
 0x112   : > { %v423_v48 = vpop.permute.xlu2 %422 }
 0x113   : > { %460 = vst.msk [vmem:[%s777_s7 + $0x58] sm:$0xff] %vm448_vm2, %v423_v48  ;;  %v425_v49 = vpop.permute.xlu0 %424 }
 0x114   : > { %461 = vst.msk [vmem:[%s777_s7 + $0x60] sm:$0xff] %vm448_vm2, %v425_v49 }
 0x11a   : > { %v429_v50 = vpop.permute.xlu2 %428 }
 0x11b   : > { %463 = vst.msk [vmem:[%s777_s7 + $0x70] sm:$0xff] %vm448_vm2, %v429_v50  ;;  %v403_v51 = vpop.permute.xlu0 %402 }
 0x11c   : > { %450 = vst.msk [vmem:[%s777_s7 + $0x8] sm:$0xff] %vm448_vm2, %v403_v51  ;;  %v405_v52 = vpop.permute.xlu1 %404 }
 0x11d   : > { %451 = vst.msk [vmem:[%s777_s7 + $0x10] sm:$0xff] %vm448_vm2, %v405_v52 }
 0x123   : > { %v419_v53 = vpop.permute.xlu0 %418 }
 0x124   : > { %458 = vst.msk [vmem:[%s777_s7 + $0x48] sm:$0xff] %vm448_vm2, %v419_v53  ;;  %v421_v54 = vpop.permute.xlu1 %420 }
 0x125   : > { %459 = vst.msk [vmem:[%s777_s7 + $0x50] sm:$0xff] %vm448_vm2, %v421_v54 }
 0x12b   : > { %v413_v55 = vpop.permute.xlu0 %412 }
 0x12c   : > { %455 = vst.msk [vmem:[%s777_s7 + $0x30] sm:$0xff] %vm448_vm2, %v413_v55  ;;  %v407_v56 = vpop.permute.xlu1 %406 }
 0x12d   : > { %452 = vst.msk [vmem:[%s777_s7 + $0x18] sm:$0xff] %vm448_vm2, %v407_v56 }
 0x133   : > { %v431_v57 = vpop.permute.xlu0 %430 }
 0x134   : > { %464 = vst.msk [vmem:[%s777_s7 + $0x78] sm:$0xff] %vm448_vm2, %v431_v57  ;;  %v415_v58 = vpop.permute.xlu1 %414 }
 0x135   : > { %456 = vst.msk [vmem:[%s777_s7 + $0x38] sm:$0xff] %vm448_vm2, %v415_v58 }
 0x13c   : > { %v427_v59 = vpop.permute.xlu1 %426 }
 0x13d   : > { %462 = vst.msk [vmem:[%s777_s7 + $0x68] sm:$0xff] %vm448_vm2, %v427_v59 }
 0x13e PF: > { %s14_s12 = sadd.s32 1, %s663_s12  }
 0x13f   : > { %p11_p4 = scmp.ge.s32.totalorder %s14_s12, 4  }
 0x141   :  { %13 = sbr.rel (!%p11_p4) target bundleno = 1 (0x1), region = 70 }

</bundles_post_ra>
